<compile_context>
chip_gen: v5e
topology: v5e:2x2
jax: 0.10.0
libtpu: 0.0.40
codegen_flags: <defaults>
</compile_context>

<pallas_src>
import functools

import jax
import jax.numpy as jnp
from jax.experimental import pallas as pl
from jax.experimental.pallas import tpu as pltpu

# Tap order: t = (kh)*3 + (kw), offsets (dh, dw) = (kh-1, kw-1).
_TAPS = tuple((dh, dw) for dh in (-1, 0, 1) for dw in (-1, 0, 1))


# ----------------------------------------------------------------------------
# Pallas kernel
# ----------------------------------------------------------------------------
def _conv3x3_rolled(x_f32, w_ref, mask_ref, *, H, W):
    """3x3 'same' conv of a lane-dense (Cin, H*W) activation.

    x_f32   : (Cin, H*W) f32 activation (lane axis = H*W).
    w_ref   : (9, Cout, Cin) bf16 per-tap weights (BN scale folded in).
    mask_ref: (9, 1, H*W)  f32 0/1 boundary masks.
    Returns (Cout, H*W) f32 accumulator (no bias).
    """
    HW = H * W
    acc = None
    for t, (dh, dw) in enumerate(_TAPS):
        s = dh * W + dw                        # this tap reads x[:, p + s]
        if s == 0:
            tap = x_f32                        # center tap: no shift, no mask
        else:
            # Circular lane rotate; the 0/1 mask zeroes every position whose
            # (h+dh, w+dw) falls outside the image (this also kills wrap-around).
            tap = pltpu.roll(x_f32, (-s) % HW, axis=1)     # XLU slot
            tap = tap * mask_ref[t]                        # (1, HW) broadcast
        contrib = jnp.dot(w_ref[t], tap.astype(jnp.bfloat16),
                          preferred_element_type=jnp.float32)
        acc = contrib if acc is None else acc + contrib
    return acc


def _basic_block_kernel(x_ref, masks_ref, w1_ref, b1_ref, w2_ref, b2_ref,
                        out_ref, *, H, W):
    """Fused BasicBlock for one batch element (everything lane-dense).

    x_ref    : (1, Cin, H*W) f32 input (lane axis = H*W)
    masks_ref: (9, 1, H*W)   f32 0/1 tap masks
    w1_ref   : (9, C1, Cin)  bf16 conv1 weights (BN1 scale folded)
    b1_ref   : (C1, 1)       f32  folded BN1 bias
    w2_ref   : (9, C2, C1)   bf16 conv2 weights (BN2 scale folded)
    b2_ref   : (C2, 1)       f32  folded BN2 bias
    out_ref  : (1, C2, H*W)  f32 output
    """
    x = x_ref[0]                                            # (Cin, HW) f32

    # conv1 + folded BN1 + ReLU (intermediate stays in vregs, never hits HBM).
    y1 = _conv3x3_rolled(x, w1_ref, masks_ref, H=H, W=W)
    y1 = jnp.maximum(y1 + b1_ref[...], 0.0)                 # (C1, HW) f32

    # conv2 + folded BN2 + residual add + ReLU.  The residual is the same
    # lane-dense block already in registers -- no reshape, exact f32 path.
    y2 = _conv3x3_rolled(y1, w2_ref, masks_ref, H=H, W=W)
    y2 = jnp.maximum(y2 + b2_ref[...] + x, 0.0)

    out_ref[0] = y2.astype(out_ref.dtype)                   # lane-dense store


# ----------------------------------------------------------------------------
# Wrapper
# ----------------------------------------------------------------------------
def _fold_bn(gamma, beta, mean, var, eps=1e-5):
    scale = gamma / jnp.sqrt(var + eps)
    return scale, beta - mean * scale


def _fold_weights(w_oihw, scale, compute_dtype):
    """OIHW conv weights * per-O BN scale -> (9, O, I) with tap t = kh*3+kw."""
    O, I = w_oihw.shape[0], w_oihw.shape[1]
    wf = w_oihw * scale[:, None, None, None]
    return jnp.transpose(wf, (2, 3, 0, 1)).reshape(9, O, I).astype(compute_dtype)


def _tap_masks(H, W):
    """(9, 1, H*W) f32 0/1 masks: tap (dh,dw) valid where (h+dh, w+dw) in image."""
    r = jnp.arange(H * W, dtype=jnp.int32) // W
    c = jnp.arange(H * W, dtype=jnp.int32) % W
    masks = []
    for dh, dw in _TAPS:
        ok = (r + dh >= 0) & (r + dh <= H - 1) & (c + dw >= 0) & (c + dw <= W - 1)
        masks.append(ok)
    return jnp.stack(masks).astype(jnp.float32).reshape(9, 1, H * W)


def basic_block_forward(x_nchw, params, *, compute_dtype=jnp.bfloat16):
    """BasicBlock forward (eval mode).  Input/output NCHW f32."""
    N, Cin, H, W = x_nchw.shape
    w1, w2 = params["w1_oihw"], params["w2_oihw"]
    C1, C2 = w1.shape[0], w2.shape[0]
    assert C2 == Cin, "identity add requires planes == inplanes (no downsample)"

    s1, b1 = _fold_bn(params["bn1_gamma"], params["bn1_beta"],
                      params["bn1_mean"], params["bn1_var"])
    s2, b2 = _fold_bn(params["bn2_gamma"], params["bn2_beta"],
                      params["bn2_mean"], params["bn2_var"])

    w1m = _fold_weights(w1, s1, compute_dtype)
    w2m = _fold_weights(w2, s2, compute_dtype)
    b1c = b1.reshape(C1, 1).astype(jnp.float32)
    b2c = b2.reshape(C2, 1).astype(jnp.float32)
    masks = _tap_masks(H, W)

    HW = H * W
    x_flat = x_nchw.reshape(N, Cin, HW)     # free row-major metadata reshape

    out_flat = pl.pallas_call(
        functools.partial(_basic_block_kernel, H=H, W=W),
        out_shape=jax.ShapeDtypeStruct((N, C2, HW), x_nchw.dtype),
        grid=(N,),
        in_specs=[
            pl.BlockSpec((1, Cin, HW), lambda n: (n, 0, 0)),   # lane-dense input
            pl.BlockSpec((9, 1, HW), lambda n: (0, 0, 0)),     # tap masks
            pl.BlockSpec((9, C1, Cin), lambda n: (0, 0, 0)),   # conv1 weights
            pl.BlockSpec((C1, 1), lambda n: (0, 0)),
            pl.BlockSpec((9, C2, C1), lambda n: (0, 0, 0)),    # conv2 weights
            pl.BlockSpec((C2, 1), lambda n: (0, 0)),
        ],
        out_specs=pl.BlockSpec((1, C2, HW), lambda n: (n, 0, 0)),
        compiler_params=pltpu.CompilerParams(
            dimension_semantics=("parallel",)),
    )(x_flat, masks, w1m, b1c, w2m, b2c)

    return out_flat.reshape(N, C2, H, W)


# ----------------------------------------------------------------------------
# Reference (same precision policy: bf16 MXU inputs, f32 accumulate/epilogue)
# ----------------------------------------------------------------------------
def _reference_forward(x_nchw, params, compute_dtype=jnp.bfloat16):
    dn = ("NCHW", "OIHW", "NCHW")

    def conv_bn(inp, w_oihw, gamma, beta, mean, var):
        s, b = _fold_bn(gamma, beta, mean, var)
        wf = (w_oihw * s[:, None, None, None]).astype(compute_dtype)
        y = jax.lax.conv_general_dilated(
            inp.astype(compute_dtype), wf, window_strides=(1, 1),
            padding=((1, 1), (1, 1)), dimension_numbers=dn,
            preferred_element_type=jnp.float32)
        return y + b.reshape(1, -1, 1, 1)

    y1 = jnp.maximum(conv_bn(x_nchw, params["w1_oihw"], params["bn1_gamma"],
                             params["bn1_beta"], params["bn1_mean"],
                             params["bn1_var"]), 0.0)
    y2 = conv_bn(y1, params["w2_oihw"], params["bn2_gamma"],
                 params["bn2_beta"], params["bn2_mean"], params["bn2_var"])
    return jnp.maximum(y2 + x_nchw, 0.0)


# ----------------------------------------------------------------------------
# Main
# ----------------------------------------------------------------------------
if __name__ == "__main__":
    key = jax.random.PRNGKey(0)
    N, C, H, W = 2, 4, 16, 16          # inplanes = planes = 4, stride = 1
    planes = C

    keys = jax.random.split(key, 8)
    x = jax.random.normal(keys[0], (N, C, H, W), jnp.float32)

    params = {
        "w1_oihw": jax.random.normal(keys[1], (planes, C, 3, 3), jnp.float32) * 0.1,
        "w2_oihw": jax.random.normal(keys[2], (planes, planes, 3, 3), jnp.float32) * 0.1,
        "bn1_gamma": 1.0 + 0.1 * jax.random.normal(keys[3], (planes,), jnp.float32),
        "bn1_beta": 0.1 * jax.random.normal(keys[4], (planes,), jnp.float32),
        "bn1_mean": 0.05 * jnp.arange(planes, dtype=jnp.float32),
        "bn1_var": jnp.ones((planes,), jnp.float32) * 0.9,
        "bn2_gamma": 1.0 + 0.1 * jax.random.normal(keys[5], (planes,), jnp.float32),
        "bn2_beta": 0.1 * jax.random.normal(keys[6], (planes,), jnp.float32),
        "bn2_mean": -0.05 * jnp.arange(planes, dtype=jnp.float32),
        "bn2_var": jnp.ones((planes,), jnp.float32) * 1.1,
    }

    out = jax.block_until_ready(basic_block_forward(x, params))
    ref = jax.block_until_ready(_reference_forward(x, params))

    assert out.shape == (N, C, H, W), out.shape
    max_err = float(jnp.max(jnp.abs(out - ref)))
    assert jnp.allclose(out, ref, atol=2e-3, rtol=2e-3), max_err
    print("KERNEL_OK")
</pallas_src>

<mosaic_0001>
module attributes {stable_mosaic.version = 11 : i64} {
  func.func @_basic_block_kernel(%arg0: i32, %arg1: memref<1x4x256xf32, #tpu.memory_space<vmem>>, %arg2: memref<9x1x256xf32, #tpu.memory_space<vmem>>, %arg3: memref<9x4x4xbf16, #tpu.memory_space<vmem>>, %arg4: memref<4x1xf32, #tpu.memory_space<vmem>>, %arg5: memref<9x4x4xbf16, #tpu.memory_space<vmem>>, %arg6: memref<4x1xf32, #tpu.memory_space<vmem>>, %arg7: memref<1x4x256xf32, #tpu.memory_space<vmem>>) attributes {dimension_semantics = [#tpu.dimension_semantics<parallel>], iteration_bounds = array<i64: 2>, scalar_prefetch = 0 : i64, scratch_operands = 0 : i64, tpu.core_type = #tpu.core_type<tc>, window_params = [{transform_indices = @transform_0, window_bounds = array<i64: 1, 4, 256>}, {pipeline_mode = #tpu.pipeline_mode<synchronous>, transform_indices = @transform_1, window_bounds = array<i64: 9, 1, 256>}, {pipeline_mode = #tpu.pipeline_mode<synchronous>, transform_indices = @transform_2, window_bounds = array<i64: 9, 4, 4>}, {pipeline_mode = #tpu.pipeline_mode<synchronous>, transform_indices = @transform_3, window_bounds = array<i64: 4, 1>}, {pipeline_mode = #tpu.pipeline_mode<synchronous>, transform_indices = @transform_4, window_bounds = array<i64: 9, 4, 4>}, {pipeline_mode = #tpu.pipeline_mode<synchronous>, transform_indices = @transform_5, window_bounds = array<i64: 4, 1>}, {transform_indices = @transform_6, window_bounds = array<i64: 1, 4, 256>}]} {
    %c0 = arith.constant 0 : index
    %c0_0 = arith.constant 0 : index
    %c0_1 = arith.constant 0 : index
    %0 = vector.load %arg1[%c0, %c0_0, %c0_1] : memref<1x4x256xf32, #tpu.memory_space<vmem>>, vector<1x4x256xf32>
    %1 = vector.shape_cast %0 : vector<1x4x256xf32> to vector<4x256xf32>
    %c17_i32 = arith.constant 17 : i32
    %2 = tpu.dynamic_rotate %1 by %c17_i32 dim 1 : vector<4x256xf32>, i32 -> vector<4x256xf32>
    %c0_2 = arith.constant 0 : index
    %c0_3 = arith.constant 0 : index
    %c0_4 = arith.constant 0 : index
    %3 = vector.load %arg2[%c0_2, %c0_3, %c0_4] : memref<9x1x256xf32, #tpu.memory_space<vmem>>, vector<1x1x256xf32>
    %4 = vector.shape_cast %3 : vector<1x1x256xf32> to vector<1x256xf32>
    %5 = vector.broadcast %4 : vector<1x256xf32> to vector<4x256xf32>
    %6 = arith.mulf %2, %5 : vector<4x256xf32>
    %c0_5 = arith.constant 0 : index
    %c0_6 = arith.constant 0 : index
    %c0_7 = arith.constant 0 : index
    %7 = vector.load %arg3[%c0_5, %c0_6, %c0_7] : memref<9x4x4xbf16, #tpu.memory_space<vmem>>, vector<1x4x4xbf16>
    %8 = vector.shape_cast %7 : vector<1x4x4xbf16> to vector<4x4xbf16>
    %9 = arith.truncf %6 : vector<4x256xf32> to vector<4x256xbf16>
    %cst = arith.constant dense<0.000000e+00> : vector<4x256xf32>
    %10 = tpu.matmul %8, %9, %cst {dimension_numbers = #tpu.dot_dimension_numbers<[1], [0], [0], [1], [0, 0, 1, 1], [], []>} : vector<4x4xbf16>, vector<4x256xbf16>, vector<4x256xf32> -> vector<4x256xf32>
    %c16_i32 = arith.constant 16 : i32
    %11 = tpu.dynamic_rotate %1 by %c16_i32 dim 1 : vector<4x256xf32>, i32 -> vector<4x256xf32>
    %c1 = arith.constant 1 : index
    %c0_8 = arith.constant 0 : index
    %c0_9 = arith.constant 0 : index
    %12 = vector.load %arg2[%c1, %c0_8, %c0_9] : memref<9x1x256xf32, #tpu.memory_space<vmem>>, vector<1x1x256xf32>
    %13 = vector.shape_cast %12 : vector<1x1x256xf32> to vector<1x256xf32>
    %14 = vector.broadcast %13 : vector<1x256xf32> to vector<4x256xf32>
    %15 = arith.mulf %11, %14 : vector<4x256xf32>
    %c1_10 = arith.constant 1 : index
    %c0_11 = arith.constant 0 : index
    %c0_12 = arith.constant 0 : index
    %16 = vector.load %arg3[%c1_10, %c0_11, %c0_12] : memref<9x4x4xbf16, #tpu.memory_space<vmem>>, vector<1x4x4xbf16>
    %17 = vector.shape_cast %16 : vector<1x4x4xbf16> to vector<4x4xbf16>
    %18 = arith.truncf %15 : vector<4x256xf32> to vector<4x256xbf16>
    %cst_13 = arith.constant dense<0.000000e+00> : vector<4x256xf32>
    %19 = tpu.matmul %17, %18, %cst_13 {dimension_numbers = #tpu.dot_dimension_numbers<[1], [0], [0], [1], [0, 0, 1, 1], [], []>} : vector<4x4xbf16>, vector<4x256xbf16>, vector<4x256xf32> -> vector<4x256xf32>
    %20 = arith.addf %10, %19 : vector<4x256xf32>
    %c15_i32 = arith.constant 15 : i32
    %21 = tpu.dynamic_rotate %1 by %c15_i32 dim 1 : vector<4x256xf32>, i32 -> vector<4x256xf32>
    %c2 = arith.constant 2 : index
    %c0_14 = arith.constant 0 : index
    %c0_15 = arith.constant 0 : index
    %22 = vector.load %arg2[%c2, %c0_14, %c0_15] : memref<9x1x256xf32, #tpu.memory_space<vmem>>, vector<1x1x256xf32>
    %23 = vector.shape_cast %22 : vector<1x1x256xf32> to vector<1x256xf32>
    %24 = vector.broadcast %23 : vector<1x256xf32> to vector<4x256xf32>
    %25 = arith.mulf %21, %24 : vector<4x256xf32>
    %c2_16 = arith.constant 2 : index
    %c0_17 = arith.constant 0 : index
    %c0_18 = arith.constant 0 : index
    %26 = vector.load %arg3[%c2_16, %c0_17, %c0_18] : memref<9x4x4xbf16, #tpu.memory_space<vmem>>, vector<1x4x4xbf16>
    %27 = vector.shape_cast %26 : vector<1x4x4xbf16> to vector<4x4xbf16>
    %28 = arith.truncf %25 : vector<4x256xf32> to vector<4x256xbf16>
    %cst_19 = arith.constant dense<0.000000e+00> : vector<4x256xf32>
    %29 = tpu.matmul %27, %28, %cst_19 {dimension_numbers = #tpu.dot_dimension_numbers<[1], [0], [0], [1], [0, 0, 1, 1], [], []>} : vector<4x4xbf16>, vector<4x256xbf16>, vector<4x256xf32> -> vector<4x256xf32>
    %30 = arith.addf %20, %29 : vector<4x256xf32>
    %c1_i32 = arith.constant 1 : i32
    %31 = tpu.dynamic_rotate %1 by %c1_i32 dim 1 : vector<4x256xf32>, i32 -> vector<4x256xf32>
    %c3 = arith.constant 3 : index
    %c0_20 = arith.constant 0 : index
    %c0_21 = arith.constant 0 : index
    %32 = vector.load %arg2[%c3, %c0_20, %c0_21] : memref<9x1x256xf32, #tpu.memory_space<vmem>>, vector<1x1x256xf32>
    %33 = vector.shape_cast %32 : vector<1x1x256xf32> to vector<1x256xf32>
    %34 = vector.broadcast %33 : vector<1x256xf32> to vector<4x256xf32>
    %35 = arith.mulf %31, %34 : vector<4x256xf32>
    %c3_22 = arith.constant 3 : index
    %c0_23 = arith.constant 0 : index
    %c0_24 = arith.constant 0 : index
    %36 = vector.load %arg3[%c3_22, %c0_23, %c0_24] : memref<9x4x4xbf16, #tpu.memory_space<vmem>>, vector<1x4x4xbf16>
    %37 = vector.shape_cast %36 : vector<1x4x4xbf16> to vector<4x4xbf16>
    %38 = arith.truncf %35 : vector<4x256xf32> to vector<4x256xbf16>
    %cst_25 = arith.constant dense<0.000000e+00> : vector<4x256xf32>
    %39 = tpu.matmul %37, %38, %cst_25 {dimension_numbers = #tpu.dot_dimension_numbers<[1], [0], [0], [1], [0, 0, 1, 1], [], []>} : vector<4x4xbf16>, vector<4x256xbf16>, vector<4x256xf32> -> vector<4x256xf32>
    %40 = arith.addf %30, %39 : vector<4x256xf32>
    %c4 = arith.constant 4 : index
    %c0_26 = arith.constant 0 : index
    %c0_27 = arith.constant 0 : index
    %41 = vector.load %arg3[%c4, %c0_26, %c0_27] : memref<9x4x4xbf16, #tpu.memory_space<vmem>>, vector<1x4x4xbf16>
    %42 = vector.shape_cast %41 : vector<1x4x4xbf16> to vector<4x4xbf16>
    %43 = arith.truncf %1 : vector<4x256xf32> to vector<4x256xbf16>
    %cst_28 = arith.constant dense<0.000000e+00> : vector<4x256xf32>
    %44 = tpu.matmul %42, %43, %cst_28 {dimension_numbers = #tpu.dot_dimension_numbers<[1], [0], [0], [1], [0, 0, 1, 1], [], []>} : vector<4x4xbf16>, vector<4x256xbf16>, vector<4x256xf32> -> vector<4x256xf32>
    %45 = arith.addf %40, %44 : vector<4x256xf32>
    %c255_i32 = arith.constant 255 : i32
    %46 = tpu.dynamic_rotate %1 by %c255_i32 dim 1 : vector<4x256xf32>, i32 -> vector<4x256xf32>
    %c5 = arith.constant 5 : index
    %c0_29 = arith.constant 0 : index
    %c0_30 = arith.constant 0 : index
    %47 = vector.load %arg2[%c5, %c0_29, %c0_30] : memref<9x1x256xf32, #tpu.memory_space<vmem>>, vector<1x1x256xf32>
    %48 = vector.shape_cast %47 : vector<1x1x256xf32> to vector<1x256xf32>
    %49 = vector.broadcast %48 : vector<1x256xf32> to vector<4x256xf32>
    %50 = arith.mulf %46, %49 : vector<4x256xf32>
    %c5_31 = arith.constant 5 : index
    %c0_32 = arith.constant 0 : index
    %c0_33 = arith.constant 0 : index
    %51 = vector.load %arg3[%c5_31, %c0_32, %c0_33] : memref<9x4x4xbf16, #tpu.memory_space<vmem>>, vector<1x4x4xbf16>
    %52 = vector.shape_cast %51 : vector<1x4x4xbf16> to vector<4x4xbf16>
    %53 = arith.truncf %50 : vector<4x256xf32> to vector<4x256xbf16>
    %cst_34 = arith.constant dense<0.000000e+00> : vector<4x256xf32>
    %54 = tpu.matmul %52, %53, %cst_34 {dimension_numbers = #tpu.dot_dimension_numbers<[1], [0], [0], [1], [0, 0, 1, 1], [], []>} : vector<4x4xbf16>, vector<4x256xbf16>, vector<4x256xf32> -> vector<4x256xf32>
    %55 = arith.addf %45, %54 : vector<4x256xf32>
    %c241_i32 = arith.constant 241 : i32
    %56 = tpu.dynamic_rotate %1 by %c241_i32 dim 1 : vector<4x256xf32>, i32 -> vector<4x256xf32>
    %c6 = arith.constant 6 : index
    %c0_35 = arith.constant 0 : index
    %c0_36 = arith.constant 0 : index
    %57 = vector.load %arg2[%c6, %c0_35, %c0_36] : memref<9x1x256xf32, #tpu.memory_space<vmem>>, vector<1x1x256xf32>
    %58 = vector.shape_cast %57 : vector<1x1x256xf32> to vector<1x256xf32>
    %59 = vector.broadcast %58 : vector<1x256xf32> to vector<4x256xf32>
    %60 = arith.mulf %56, %59 : vector<4x256xf32>
    %c6_37 = arith.constant 6 : index
    %c0_38 = arith.constant 0 : index
    %c0_39 = arith.constant 0 : index
    %61 = vector.load %arg3[%c6_37, %c0_38, %c0_39] : memref<9x4x4xbf16, #tpu.memory_space<vmem>>, vector<1x4x4xbf16>
    %62 = vector.shape_cast %61 : vector<1x4x4xbf16> to vector<4x4xbf16>
    %63 = arith.truncf %60 : vector<4x256xf32> to vector<4x256xbf16>
    %cst_40 = arith.constant dense<0.000000e+00> : vector<4x256xf32>
    %64 = tpu.matmul %62, %63, %cst_40 {dimension_numbers = #tpu.dot_dimension_numbers<[1], [0], [0], [1], [0, 0, 1, 1], [], []>} : vector<4x4xbf16>, vector<4x256xbf16>, vector<4x256xf32> -> vector<4x256xf32>
    %65 = arith.addf %55, %64 : vector<4x256xf32>
    %c240_i32 = arith.constant 240 : i32
    %66 = tpu.dynamic_rotate %1 by %c240_i32 dim 1 : vector<4x256xf32>, i32 -> vector<4x256xf32>
    %c7 = arith.constant 7 : index
    %c0_41 = arith.constant 0 : index
    %c0_42 = arith.constant 0 : index
    %67 = vector.load %arg2[%c7, %c0_41, %c0_42] : memref<9x1x256xf32, #tpu.memory_space<vmem>>, vector<1x1x256xf32>
    %68 = vector.shape_cast %67 : vector<1x1x256xf32> to vector<1x256xf32>
    %69 = vector.broadcast %68 : vector<1x256xf32> to vector<4x256xf32>
    %70 = arith.mulf %66, %69 : vector<4x256xf32>
    %c7_43 = arith.constant 7 : index
    %c0_44 = arith.constant 0 : index
    %c0_45 = arith.constant 0 : index
    %71 = vector.load %arg3[%c7_43, %c0_44, %c0_45] : memref<9x4x4xbf16, #tpu.memory_space<vmem>>, vector<1x4x4xbf16>
    %72 = vector.shape_cast %71 : vector<1x4x4xbf16> to vector<4x4xbf16>
    %73 = arith.truncf %70 : vector<4x256xf32> to vector<4x256xbf16>
    %cst_46 = arith.constant dense<0.000000e+00> : vector<4x256xf32>
    %74 = tpu.matmul %72, %73, %cst_46 {dimension_numbers = #tpu.dot_dimension_numbers<[1], [0], [0], [1], [0, 0, 1, 1], [], []>} : vector<4x4xbf16>, vector<4x256xbf16>, vector<4x256xf32> -> vector<4x256xf32>
    %75 = arith.addf %65, %74 : vector<4x256xf32>
    %c239_i32 = arith.constant 239 : i32
    %76 = tpu.dynamic_rotate %1 by %c239_i32 dim 1 : vector<4x256xf32>, i32 -> vector<4x256xf32>
    %c8 = arith.constant 8 : index
    %c0_47 = arith.constant 0 : index
    %c0_48 = arith.constant 0 : index
    %77 = vector.load %arg2[%c8, %c0_47, %c0_48] : memref<9x1x256xf32, #tpu.memory_space<vmem>>, vector<1x1x256xf32>
    %78 = vector.shape_cast %77 : vector<1x1x256xf32> to vector<1x256xf32>
    %79 = vector.broadcast %78 : vector<1x256xf32> to vector<4x256xf32>
    %80 = arith.mulf %76, %79 : vector<4x256xf32>
    %c8_49 = arith.constant 8 : index
    %c0_50 = arith.constant 0 : index
    %c0_51 = arith.constant 0 : index
    %81 = vector.load %arg3[%c8_49, %c0_50, %c0_51] : memref<9x4x4xbf16, #tpu.memory_space<vmem>>, vector<1x4x4xbf16>
    %82 = vector.shape_cast %81 : vector<1x4x4xbf16> to vector<4x4xbf16>
    %83 = arith.truncf %80 : vector<4x256xf32> to vector<4x256xbf16>
    %cst_52 = arith.constant dense<0.000000e+00> : vector<4x256xf32>
    %84 = tpu.matmul %82, %83, %cst_52 {dimension_numbers = #tpu.dot_dimension_numbers<[1], [0], [0], [1], [0, 0, 1, 1], [], []>} : vector<4x4xbf16>, vector<4x256xbf16>, vector<4x256xf32> -> vector<4x256xf32>
    %85 = arith.addf %75, %84 : vector<4x256xf32>
    %c0_53 = arith.constant 0 : index
    %c0_54 = arith.constant 0 : index
    %86 = vector.load %arg4[%c0_53, %c0_54] : memref<4x1xf32, #tpu.memory_space<vmem>>, vector<4x1xf32>
    %87 = vector.broadcast %86 : vector<4x1xf32> to vector<4x256xf32>
    %88 = arith.addf %85, %87 : vector<4x256xf32>
    %cst_55 = arith.constant 0.000000e+00 : f32
    %89 = vector.broadcast %cst_55 : f32 to vector<4x256xf32>
    %90 = arith.maximumf %88, %89 : vector<4x256xf32>
    %c17_i32_56 = arith.constant 17 : i32
    %91 = tpu.dynamic_rotate %90 by %c17_i32_56 dim 1 : vector<4x256xf32>, i32 -> vector<4x256xf32>
    %c0_57 = arith.constant 0 : index
    %c0_58 = arith.constant 0 : index
    %c0_59 = arith.constant 0 : index
    %92 = vector.load %arg2[%c0_57, %c0_58, %c0_59] : memref<9x1x256xf32, #tpu.memory_space<vmem>>, vector<1x1x256xf32>
    %93 = vector.shape_cast %92 : vector<1x1x256xf32> to vector<1x256xf32>
    %94 = vector.broadcast %93 : vector<1x256xf32> to vector<4x256xf32>
    %95 = arith.mulf %91, %94 : vector<4x256xf32>
    %c0_60 = arith.constant 0 : index
    %c0_61 = arith.constant 0 : index
    %c0_62 = arith.constant 0 : index
    %96 = vector.load %arg5[%c0_60, %c0_61, %c0_62] : memref<9x4x4xbf16, #tpu.memory_space<vmem>>, vector<1x4x4xbf16>
    %97 = vector.shape_cast %96 : vector<1x4x4xbf16> to vector<4x4xbf16>
    %98 = arith.truncf %95 : vector<4x256xf32> to vector<4x256xbf16>
    %cst_63 = arith.constant dense<0.000000e+00> : vector<4x256xf32>
    %99 = tpu.matmul %97, %98, %cst_63 {dimension_numbers = #tpu.dot_dimension_numbers<[1], [0], [0], [1], [0, 0, 1, 1], [], []>} : vector<4x4xbf16>, vector<4x256xbf16>, vector<4x256xf32> -> vector<4x256xf32>
    %c16_i32_64 = arith.constant 16 : i32
    %100 = tpu.dynamic_rotate %90 by %c16_i32_64 dim 1 : vector<4x256xf32>, i32 -> vector<4x256xf32>
    %c1_65 = arith.constant 1 : index
    %c0_66 = arith.constant 0 : index
    %c0_67 = arith.constant 0 : index
    %101 = vector.load %arg2[%c1_65, %c0_66, %c0_67] : memref<9x1x256xf32, #tpu.memory_space<vmem>>, vector<1x1x256xf32>
    %102 = vector.shape_cast %101 : vector<1x1x256xf32> to vector<1x256xf32>
    %103 = vector.broadcast %102 : vector<1x256xf32> to vector<4x256xf32>
    %104 = arith.mulf %100, %103 : vector<4x256xf32>
    %c1_68 = arith.constant 1 : index
    %c0_69 = arith.constant 0 : index
    %c0_70 = arith.constant 0 : index
    %105 = vector.load %arg5[%c1_68, %c0_69, %c0_70] : memref<9x4x4xbf16, #tpu.memory_space<vmem>>, vector<1x4x4xbf16>
    %106 = vector.shape_cast %105 : vector<1x4x4xbf16> to vector<4x4xbf16>
    %107 = arith.truncf %104 : vector<4x256xf32> to vector<4x256xbf16>
    %cst_71 = arith.constant dense<0.000000e+00> : vector<4x256xf32>
    %108 = tpu.matmul %106, %107, %cst_71 {dimension_numbers = #tpu.dot_dimension_numbers<[1], [0], [0], [1], [0, 0, 1, 1], [], []>} : vector<4x4xbf16>, vector<4x256xbf16>, vector<4x256xf32> -> vector<4x256xf32>
    %109 = arith.addf %99, %108 : vector<4x256xf32>
    %c15_i32_72 = arith.constant 15 : i32
    %110 = tpu.dynamic_rotate %90 by %c15_i32_72 dim 1 : vector<4x256xf32>, i32 -> vector<4x256xf32>
    %c2_73 = arith.constant 2 : index
    %c0_74 = arith.constant 0 : index
    %c0_75 = arith.constant 0 : index
    %111 = vector.load %arg2[%c2_73, %c0_74, %c0_75] : memref<9x1x256xf32, #tpu.memory_space<vmem>>, vector<1x1x256xf32>
    %112 = vector.shape_cast %111 : vector<1x1x256xf32> to vector<1x256xf32>
    %113 = vector.broadcast %112 : vector<1x256xf32> to vector<4x256xf32>
    %114 = arith.mulf %110, %113 : vector<4x256xf32>
    %c2_76 = arith.constant 2 : index
    %c0_77 = arith.constant 0 : index
    %c0_78 = arith.constant 0 : index
    %115 = vector.load %arg5[%c2_76, %c0_77, %c0_78] : memref<9x4x4xbf16, #tpu.memory_space<vmem>>, vector<1x4x4xbf16>
    %116 = vector.shape_cast %115 : vector<1x4x4xbf16> to vector<4x4xbf16>
    %117 = arith.truncf %114 : vector<4x256xf32> to vector<4x256xbf16>
    %cst_79 = arith.constant dense<0.000000e+00> : vector<4x256xf32>
    %118 = tpu.matmul %116, %117, %cst_79 {dimension_numbers = #tpu.dot_dimension_numbers<[1], [0], [0], [1], [0, 0, 1, 1], [], []>} : vector<4x4xbf16>, vector<4x256xbf16>, vector<4x256xf32> -> vector<4x256xf32>
    %119 = arith.addf %109, %118 : vector<4x256xf32>
    %c1_i32_80 = arith.constant 1 : i32
    %120 = tpu.dynamic_rotate %90 by %c1_i32_80 dim 1 : vector<4x256xf32>, i32 -> vector<4x256xf32>
    %c3_81 = arith.constant 3 : index
    %c0_82 = arith.constant 0 : index
    %c0_83 = arith.constant 0 : index
    %121 = vector.load %arg2[%c3_81, %c0_82, %c0_83] : memref<9x1x256xf32, #tpu.memory_space<vmem>>, vector<1x1x256xf32>
    %122 = vector.shape_cast %121 : vector<1x1x256xf32> to vector<1x256xf32>
    %123 = vector.broadcast %122 : vector<1x256xf32> to vector<4x256xf32>
    %124 = arith.mulf %120, %123 : vector<4x256xf32>
    %c3_84 = arith.constant 3 : index
    %c0_85 = arith.constant 0 : index
    %c0_86 = arith.constant 0 : index
    %125 = vector.load %arg5[%c3_84, %c0_85, %c0_86] : memref<9x4x4xbf16, #tpu.memory_space<vmem>>, vector<1x4x4xbf16>
    %126 = vector.shape_cast %125 : vector<1x4x4xbf16> to vector<4x4xbf16>
    %127 = arith.truncf %124 : vector<4x256xf32> to vector<4x256xbf16>
    %cst_87 = arith.constant dense<0.000000e+00> : vector<4x256xf32>
    %128 = tpu.matmul %126, %127, %cst_87 {dimension_numbers = #tpu.dot_dimension_numbers<[1], [0], [0], [1], [0, 0, 1, 1], [], []>} : vector<4x4xbf16>, vector<4x256xbf16>, vector<4x256xf32> -> vector<4x256xf32>
    %129 = arith.addf %119, %128 : vector<4x256xf32>
    %c4_88 = arith.constant 4 : index
    %c0_89 = arith.constant 0 : index
    %c0_90 = arith.constant 0 : index
    %130 = vector.load %arg5[%c4_88, %c0_89, %c0_90] : memref<9x4x4xbf16, #tpu.memory_space<vmem>>, vector<1x4x4xbf16>
    %131 = vector.shape_cast %130 : vector<1x4x4xbf16> to vector<4x4xbf16>
    %132 = arith.truncf %90 : vector<4x256xf32> to vector<4x256xbf16>
    %cst_91 = arith.constant dense<0.000000e+00> : vector<4x256xf32>
    %133 = tpu.matmul %131, %132, %cst_91 {dimension_numbers = #tpu.dot_dimension_numbers<[1], [0], [0], [1], [0, 0, 1, 1], [], []>} : vector<4x4xbf16>, vector<4x256xbf16>, vector<4x256xf32> -> vector<4x256xf32>
    %134 = arith.addf %129, %133 : vector<4x256xf32>
    %c255_i32_92 = arith.constant 255 : i32
    %135 = tpu.dynamic_rotate %90 by %c255_i32_92 dim 1 : vector<4x256xf32>, i32 -> vector<4x256xf32>
    %c5_93 = arith.constant 5 : index
    %c0_94 = arith.constant 0 : index
    %c0_95 = arith.constant 0 : index
    %136 = vector.load %arg2[%c5_93, %c0_94, %c0_95] : memref<9x1x256xf32, #tpu.memory_space<vmem>>, vector<1x1x256xf32>
    %137 = vector.shape_cast %136 : vector<1x1x256xf32> to vector<1x256xf32>
    %138 = vector.broadcast %137 : vector<1x256xf32> to vector<4x256xf32>
    %139 = arith.mulf %135, %138 : vector<4x256xf32>
    %c5_96 = arith.constant 5 : index
    %c0_97 = arith.constant 0 : index
    %c0_98 = arith.constant 0 : index
    %140 = vector.load %arg5[%c5_96, %c0_97, %c0_98] : memref<9x4x4xbf16, #tpu.memory_space<vmem>>, vector<1x4x4xbf16>
    %141 = vector.shape_cast %140 : vector<1x4x4xbf16> to vector<4x4xbf16>
    %142 = arith.truncf %139 : vector<4x256xf32> to vector<4x256xbf16>
    %cst_99 = arith.constant dense<0.000000e+00> : vector<4x256xf32>
    %143 = tpu.matmul %141, %142, %cst_99 {dimension_numbers = #tpu.dot_dimension_numbers<[1], [0], [0], [1], [0, 0, 1, 1], [], []>} : vector<4x4xbf16>, vector<4x256xbf16>, vector<4x256xf32> -> vector<4x256xf32>
    %144 = arith.addf %134, %143 : vector<4x256xf32>
    %c241_i32_100 = arith.constant 241 : i32
    %145 = tpu.dynamic_rotate %90 by %c241_i32_100 dim 1 : vector<4x256xf32>, i32 -> vector<4x256xf32>
    %c6_101 = arith.constant 6 : index
    %c0_102 = arith.constant 0 : index
    %c0_103 = arith.constant 0 : index
    %146 = vector.load %arg2[%c6_101, %c0_102, %c0_103] : memref<9x1x256xf32, #tpu.memory_space<vmem>>, vector<1x1x256xf32>
    %147 = vector.shape_cast %146 : vector<1x1x256xf32> to vector<1x256xf32>
    %148 = vector.broadcast %147 : vector<1x256xf32> to vector<4x256xf32>
    %149 = arith.mulf %145, %148 : vector<4x256xf32>
    %c6_104 = arith.constant 6 : index
    %c0_105 = arith.constant 0 : index
    %c0_106 = arith.constant 0 : index
    %150 = vector.load %arg5[%c6_104, %c0_105, %c0_106] : memref<9x4x4xbf16, #tpu.memory_space<vmem>>, vector<1x4x4xbf16>
    %151 = vector.shape_cast %150 : vector<1x4x4xbf16> to vector<4x4xbf16>
    %152 = arith.truncf %149 : vector<4x256xf32> to vector<4x256xbf16>
    %cst_107 = arith.constant dense<0.000000e+00> : vector<4x256xf32>
    %153 = tpu.matmul %151, %152, %cst_107 {dimension_numbers = #tpu.dot_dimension_numbers<[1], [0], [0], [1], [0, 0, 1, 1], [], []>} : vector<4x4xbf16>, vector<4x256xbf16>, vector<4x256xf32> -> vector<4x256xf32>
    %154 = arith.addf %144, %153 : vector<4x256xf32>
    %c240_i32_108 = arith.constant 240 : i32
    %155 = tpu.dynamic_rotate %90 by %c240_i32_108 dim 1 : vector<4x256xf32>, i32 -> vector<4x256xf32>
    %c7_109 = arith.constant 7 : index
    %c0_110 = arith.constant 0 : index
    %c0_111 = arith.constant 0 : index
    %156 = vector.load %arg2[%c7_109, %c0_110, %c0_111] : memref<9x1x256xf32, #tpu.memory_space<vmem>>, vector<1x1x256xf32>
    %157 = vector.shape_cast %156 : vector<1x1x256xf32> to vector<1x256xf32>
    %158 = vector.broadcast %157 : vector<1x256xf32> to vector<4x256xf32>
    %159 = arith.mulf %155, %158 : vector<4x256xf32>
    %c7_112 = arith.constant 7 : index
    %c0_113 = arith.constant 0 : index
    %c0_114 = arith.constant 0 : index
    %160 = vector.load %arg5[%c7_112, %c0_113, %c0_114] : memref<9x4x4xbf16, #tpu.memory_space<vmem>>, vector<1x4x4xbf16>
    %161 = vector.shape_cast %160 : vector<1x4x4xbf16> to vector<4x4xbf16>
    %162 = arith.truncf %159 : vector<4x256xf32> to vector<4x256xbf16>
    %cst_115 = arith.constant dense<0.000000e+00> : vector<4x256xf32>
    %163 = tpu.matmul %161, %162, %cst_115 {dimension_numbers = #tpu.dot_dimension_numbers<[1], [0], [0], [1], [0, 0, 1, 1], [], []>} : vector<4x4xbf16>, vector<4x256xbf16>, vector<4x256xf32> -> vector<4x256xf32>
    %164 = arith.addf %154, %163 : vector<4x256xf32>
    %c239_i32_116 = arith.constant 239 : i32
    %165 = tpu.dynamic_rotate %90 by %c239_i32_116 dim 1 : vector<4x256xf32>, i32 -> vector<4x256xf32>
    %c8_117 = arith.constant 8 : index
    %c0_118 = arith.constant 0 : index
    %c0_119 = arith.constant 0 : index
    %166 = vector.load %arg2[%c8_117, %c0_118, %c0_119] : memref<9x1x256xf32, #tpu.memory_space<vmem>>, vector<1x1x256xf32>
    %167 = vector.shape_cast %166 : vector<1x1x256xf32> to vector<1x256xf32>
    %168 = vector.broadcast %167 : vector<1x256xf32> to vector<4x256xf32>
    %169 = arith.mulf %165, %168 : vector<4x256xf32>
    %c8_120 = arith.constant 8 : index
    %c0_121 = arith.constant 0 : index
    %c0_122 = arith.constant 0 : index
    %170 = vector.load %arg5[%c8_120, %c0_121, %c0_122] : memref<9x4x4xbf16, #tpu.memory_space<vmem>>, vector<1x4x4xbf16>
    %171 = vector.shape_cast %170 : vector<1x4x4xbf16> to vector<4x4xbf16>
    %172 = arith.truncf %169 : vector<4x256xf32> to vector<4x256xbf16>
    %cst_123 = arith.constant dense<0.000000e+00> : vector<4x256xf32>
    %173 = tpu.matmul %171, %172, %cst_123 {dimension_numbers = #tpu.dot_dimension_numbers<[1], [0], [0], [1], [0, 0, 1, 1], [], []>} : vector<4x4xbf16>, vector<4x256xbf16>, vector<4x256xf32> -> vector<4x256xf32>
    %174 = arith.addf %164, %173 : vector<4x256xf32>
    %c0_124 = arith.constant 0 : index
    %c0_125 = arith.constant 0 : index
    %175 = vector.load %arg6[%c0_124, %c0_125] : memref<4x1xf32, #tpu.memory_space<vmem>>, vector<4x1xf32>
    %176 = vector.broadcast %175 : vector<4x1xf32> to vector<4x256xf32>
    %177 = arith.addf %174, %176 : vector<4x256xf32>
    %178 = arith.addf %177, %1 : vector<4x256xf32>
    %cst_126 = arith.constant 0.000000e+00 : f32
    %179 = vector.broadcast %cst_126 : f32 to vector<4x256xf32>
    %180 = arith.maximumf %178, %179 : vector<4x256xf32>
    %c0_127 = arith.constant 0 : index
    %c0_128 = arith.constant 0 : index
    %c0_129 = arith.constant 0 : index
    %181 = vector.load %arg7[%c0_127, %c0_128, %c0_129] : memref<1x4x256xf32, #tpu.memory_space<vmem>>, vector<1x4x256xf32>
    %182 = vector.shape_cast %181 : vector<1x4x256xf32> to vector<4x256xf32>
    %183 = vector.shape_cast %180 : vector<4x256xf32> to vector<1x4x256xf32>
    tpu.vector_store %arg7[%c0_127, %c0_128, %c0_129], %183 {strides = array<i32>} : memref<1x4x256xf32, #tpu.memory_space<vmem>>, vector<1x4x256xf32>,
    return
  }
  func.func @transform_0(%arg0: i32) -> (i32, i32, i32) {
    %c0_i32 = arith.constant 0 : i32
    %c0_i32_0 = arith.constant 0 : i32
    %c0_i32_1 = arith.constant 0 : i32
    return %arg0, %c0_i32, %c0_i32_0 : i32, i32, i32
  }
  func.func @transform_1(%arg0: i32) -> (i32, i32, i32) {
    %c0_i32 = arith.constant 0 : i32
    %c0_i32_0 = arith.constant 0 : i32
    %c0_i32_1 = arith.constant 0 : i32
    %c0_i32_2 = arith.constant 0 : i32
    return %c0_i32, %c0_i32_0, %c0_i32_1 : i32, i32, i32
  }
  func.func @transform_2(%arg0: i32) -> (i32, i32, i32) {
    %c0_i32 = arith.constant 0 : i32
    %c0_i32_0 = arith.constant 0 : i32
    %c0_i32_1 = arith.constant 0 : i32
    %c0_i32_2 = arith.constant 0 : i32
    return %c0_i32, %c0_i32_0, %c0_i32_1 : i32, i32, i32
  }
  func.func @transform_3(%arg0: i32) -> (i32, i32) {
    %c0_i32 = arith.constant 0 : i32
    %c0_i32_0 = arith.constant 0 : i32
    %c0_i32_1 = arith.constant 0 : i32
    return %c0_i32, %c0_i32_0 : i32, i32
  }
  func.func @transform_4(%arg0: i32) -> (i32, i32, i32) {
    %c0_i32 = arith.constant 0 : i32
    %c0_i32_0 = arith.constant 0 : i32
    %c0_i32_1 = arith.constant 0 : i32
    %c0_i32_2 = arith.constant 0 : i32
    return %c0_i32, %c0_i32_0, %c0_i32_1 : i32, i32, i32
  }
  func.func @transform_5(%arg0: i32) -> (i32, i32) {
    %c0_i32 = arith.constant 0 : i32
    %c0_i32_0 = arith.constant 0 : i32
    %c0_i32_1 = arith.constant 0 : i32
    return %c0_i32, %c0_i32_0 : i32, i32
  }
  func.func @transform_6(%arg0: i32) -> (i32, i32, i32) {
    %c0_i32 = arith.constant 0 : i32
    %c0_i32_0 = arith.constant 0 : i32
    %c0_i32_1 = arith.constant 0 : i32
    return %arg0, %c0_i32, %c0_i32_0 : i32, i32, i32
  }
}

</mosaic_0001>

<bundles_post_ra>
// kernel: tpu_custom_call.1
= control target key start
LH: loop header
LB: loop body
LE: loop exit
PB: predicated region body
PF: predicated region fallthrough
CT: control target
= control target key end

     0   :  { %11 = vsyncpa [#allocation3], 0  ;;  %s2017_s0 = inlined_call_operand.vmem [shape: f32[2,4,256], index: 0, kind: input, shape index: {}]   ;;  %s2018_s1 = inlined_call_operand.vmem [shape: f32[9,1,256], index: 1, kind: input, shape index: {}]   ;;  %s2019_s2 = inlined_call_operand.vmem [shape: bf16[9,4,4], index: 2, kind: input, shape index: {}]   ;;  %s2020_s3 = inlined_call_operand.vmem [shape: f32[4,1], index: 3, kind: input, shape index: {}]   ;;  %s2021_s4 = inlined_call_operand.vmem [shape: bf16[9,4,4], index: 4, kind: input, shape index: {}]   ;;  %s2022_s5 = inlined_call_operand.vmem [shape: f32[4,1], index: 5, kind: input, shape index: {}]   ;;  %s2023_s6 = inlined_call_operand.hbm [shape: f32[2,4,256], index: 6, kind: output, shape index: {}]  }
   0x1   :  { %13 = vsyncpa [#allocation3 + $0x1], 0  ;;  %s1562_s21 = smov 0   ;;  %s1564_s22 = smov 0  }
   0x2   :  { %s1566_s23 = smov 0   ;;  %s1568_s24 = smov 0  }
   0x3 LB: > { %s1583_s25 = sadd.s32 4294967295, %s1516_s24   ;;  %s1331_s26 = sadd.s32 4294967294, %s1516_s24   ;;  %s1516_s24 = sphi %s1568_s24, %s2029_s24   ;;  %s1512_s23 = sphi %s1566_s23, %s2028_s23   ;;  %s1508_s22 = sphi %s1564_s22, %s2027_s22   ;;  %s1504_s21 = sphi %s1562_s21, %s2026_s21  }
   0x4   : > { %s1587_s27 = sadd.s32 1, %s1516_s24   ;;  %s157_s28 = sadd.s32 1, %s1512_s23 }
   0x5   : > { %s154_s29 = ssub.s32 %s1516_s24, %s1587_s27  ;;  %p167_p0 = scmp.ne.s32.totalorder %s1512_s23, %s1508_s22 }
   0x6   : > { %p155_p1 = scmp.eq.s32.totalorder %s154_s29, 0  ;;  %p168_p2 = scmp.eq.s32.totalorder %s1583_s25, 1 }
   0x7   : > { %p173_p3 = scmp.ne.s32.totalorder %s1508_s22, %s1504_s21  ;;  %p174_p4 = scmp.eq.s32.totalorder %s1331_s26, 1 }
   0x8   : > { %s1598_s30 = scalar_select %p155_p1, %s1512_s23, %s157_s28  }
   0x9   : > { %p1600_p5 = por %p168_p2, %p167_p0  ;;  %p1604_p6 = por %p174_p4, %p173_p3 }
   0xa   : > { %p1334_p7 = scmp.ge.s32.totalorder %s1516_s24, 1  ;;  %p215_p8 = scmp.lt.s32.totalorder %s1516_s24, 3 }
   0xc   : > { %p216_p9 = pnand %p1334_p7, %p215_p8 }
   0xd   : > { %p245_p10 = scmp.lt.s32.totalorder (!%p216_p9), %s1583_s25, 1  ;;  %s1518_s14 = smov (!%p216_p9), 17  }
   0xe   : > { %219 = sbr.rel (%p216_p9) target bundleno = 702 (0x2be), region = 44  ;;  %s1519_s15 = smov (!%p216_p9), 16  }
   0xf   : > { %s1520_s16 = smov (!%p216_p9), 15   ;;  %s1521_s17 = smov (!%p216_p9), 1  }
  0x10   : > { %s1522_s18 = smov (!%p216_p9), 127   ;;  %s1523_s19 = smov (!%p216_p9), 113  }
  0x11   : > { %s1524_s20 = smov (!%p216_p9), 112   ;;  %s1525_s26 = smov (!%p216_p9), 111  }
  0x13   : > { %s246_s9 = scalar_select %p245_p10, %s1583_s25, 1  ;;  %v262_v20 = vlaneseq  ;;  %v1640_v23 = vld [vmem:[%s2018_s1] sm:$0x3]  ;;  %v1648_v26 = vld [vmem:[%s2018_s1 + $0x4] sm:$0x3]  ;;  %vm307_vm2 = vcmask 1041408  }
  0x14   : > { %v270_v24 = vperm.slane %v1640_v23, 1  ;;  %v269_v25 = vperm.slane %v1640_v23, 0  ;;  %v390_v32 = vperm.slane %v1648_v26, 0  ;;  %v391_v33 = vperm.slane %v1648_v26, 1  ;;  %v1668_v38 = vld [vmem:[%s2018_s1 + $0x2] sm:$0x3] }
  0x15   : > { %s1402_s10 = sshll.u32 %s246_s9, 3  ;;  %v1635_v22 = vand.u32 127, %v262_v20  ;;  %v293_v45 = vperm.slane %v1668_v38, 0  ;;  %v294_v46 = vperm.slane %v1668_v38, 1  ;;  %v275_v47 = vld [vmem:[%s2019_s2] sm:$0x3] }
  0x16   : > { %s249_s13 = scalar_lea.vmem %s2017_s0, %s1402_s10  ;;  %vm303_vm4 = vcmask 31744   ;;  %v1695_v55 = vld [vmem:[%s2018_s1 + $0x6] sm:$0x3]  ;;  %v1345_v20 = vld [vmem:[%s2019_s2 + $0x4] sm:$0x3]  ;;  %vm1251_vm10 = vcmask 1043456  }
  0x17   : > { %v251_v0 = vld [vmem:[%s249_s13] sm:$0xff]  ;;  %vm264_vm0 = vcmp.lt.s32.totalorder %v1635_v22, 17  ;;  %vm384_vm1 = vcmp.lt.s32.totalorder %v1635_v22, 15  ;;  %vm287_vm3 = vcmp.lt.s32.totalorder %v1635_v22, 16  ;;  %vm446_vm5 = vcmp.lt.s32.totalorder %v1635_v22, 1 }
  0x18   : > { %253 = vst [vmem:[#allocation1] ss:$2 sm:$0xff] %v251_v0  ;;  %vm554_vm6 = vcmp.lt.s32.totalorder %v1635_v22, 127  ;;  %vm616_vm7 = vcmp.lt.s32.totalorder %v1635_v22, 113  ;;  %vm678_vm8 = vcmp.lt.s32.totalorder %v1635_v22, 112  ;;  %vm740_vm9 = vcmp.lt.s32.totalorder %v1635_v22, 111 }
  0x19   : > { %v1371_v26 = vld [vmem:[%s2021_s4 + $0x2] sm:$0x3]  ;;  %v811_v23 = vld [vmem:[%s2021_s4] sm:$0x3] }
  0x1f   : > { %v254_v1 = vld.sshfl [vmem:[#allocation1] sm:$0xff pattern:$0x75316420]  ;;  %v255_v2 = vld.sshfl [vmem:[#allocation1 + $0x8] sm:$0xff pattern:$0x75316420] }
  0x20   : > { %258 = vrot.lane.b32.xlu1 %v254_v1, %s1518_s14  ;;  %278 = vst [vmem:[#allocation1] ss:$2 sm:$0xff] %v251_v0  ;;  %v453_v1 = vperm.slane %v1695_v55, 1 }
  0x27   : > { %v279_v3 = vld.sshfl [vmem:[#allocation1] sm:$0xff pattern:$0x75316420]  ;;  %v280_v4 = vld.sshfl [vmem:[#allocation1 + $0x8] sm:$0xff pattern:$0x75316420] }
  0x28   : > { %283 = vrot.lane.b32.xlu0 %v279_v3, %s1519_s15  ;;  %260 = vrot.lane.b32.xlu1 %v255_v2, %s1518_s14  ;;  %375 = vst [vmem:[#allocation1] ss:$2 sm:$0xff] %v251_v0  ;;  %v1339_v2 = vld [vmem:[%s2019_s2 + $0x2] sm:$0x3] }
  0x2f   : > { %v376_v5 = vld.sshfl [vmem:[#allocation1] sm:$0xff pattern:$0x75316420]  ;;  %v377_v6 = vld.sshfl [vmem:[#allocation1 + $0x8] sm:$0xff pattern:$0x75316420] }
  0x30   : > { %285 = vrot.lane.b32.xlu0 %v280_v4, %s1519_s15  ;;  %437 = vst [vmem:[#allocation1] ss:$2 sm:$0xff] %v251_v0  ;;  %380 = vrot.lane.b32.xlu2 %v376_v5, %s1520_s16 }
  0x37   : > { %v439_v7 = vld.sshfl [vmem:[#allocation1 + $0x8] sm:$0xff pattern:$0x75316420]  ;;  %v438_v8 = vld.sshfl [vmem:[#allocation1] sm:$0xff pattern:$0x75316420] }
  0x38   : > { %444 = vrot.lane.b32.xlu1 %v439_v7, %s1521_s17  ;;  %442 = vrot.lane.b32.xlu0 %v438_v8, %s1521_s17  ;;  %501 = vst [vmem:[#allocation1] ss:$2 sm:$0xff] %v251_v0 }
  0x39   : > { %382 = vrot.lane.b32.xlu2 %v377_v6, %s1520_s16 }
  0x3f   : > { %v1623_v9 = vld.sshfl [vmem:[#allocation1] sm:$0xff pattern:$0x75316420]  ;;  %v1625_v10 = vld.sshfl [vmem:[#allocation1 + $0x8] sm:$0xff pattern:$0x75316420] }
  0x40   : > { %545 = vst [vmem:[#allocation1] ss:$2 sm:$0xff] %v251_v0  ;;  %v506_v58 = vpack.c.bf16 %v1623_v9, %v1623_v9  ;;  %v507_v59 = vpack.c.bf16 %v1625_v10, %v1625_v10 }
  0x42   : > { %v512_v5 = vsel %vm307_vm2, %v506_v58, 0  ;;  %v515_v6 = vsel %vm307_vm2, %v507_v59, 0  ;;  %v1352_v58 = vld [vmem:[%s2019_s2 + $0x8] sm:$0x3] }
  0x47   : > { %v547_v11 = vld.sshfl [vmem:[#allocation1 + $0x8] sm:$0xff pattern:$0x75316420]  ;;  %v546_v12 = vld.sshfl [vmem:[#allocation1] sm:$0xff pattern:$0x75316420] }
  0x48   : > { %552 = vrot.lane.b32.xlu0 %v547_v11, %s1522_s18  ;;  %607 = vst [vmem:[#allocation1] ss:$2 sm:$0xff] %v251_v0  ;;  %550 = vrot.lane.b32.xlu2 %v546_v12, %s1522_s18 }
  0x4f   : > { %v608_v13 = vld.sshfl [vmem:[#allocation1] sm:$0xff pattern:$0x75316420]  ;;  %v609_v14 = vld.sshfl [vmem:[#allocation1 + $0x8] sm:$0xff pattern:$0x75316420] }
  0x50   : > { %612 = vrot.lane.b32.xlu1 %v608_v13, %s1523_s19  ;;  %669 = vst [vmem:[#allocation1] ss:$2 sm:$0xff] %v251_v0  ;;  %614 = vrot.lane.b32.xlu2 %v609_v14, %s1523_s19 }
  0x57   : > { %v671_v15 = vld.sshfl [vmem:[#allocation1 + $0x8] sm:$0xff pattern:$0x75316420]  ;;  %v670_v16 = vld.sshfl [vmem:[#allocation1] sm:$0xff pattern:$0x75316420] }
  0x58   : > { %676 = vrot.lane.b32.xlu1 %v671_v15, %s1524_s20  ;;  %674 = vrot.lane.b32.xlu0 %v670_v16, %s1524_s20  ;;  %731 = vst [vmem:[#allocation1] ss:$2 sm:$0xff] %v251_v0  ;;  %v1349_v15 = vld [vmem:[%s2019_s2 + $0x6] sm:$0x3]  ;;  %v1733_v16 = vld [vmem:[%s2018_s1 + $0xa] sm:$0x3] }
  0x5f   : > { %v733_v17 = vld.sshfl [vmem:[#allocation1 + $0x8] sm:$0xff pattern:$0x75316420]  ;;  %v732_v18 = vld.sshfl [vmem:[#allocation1] sm:$0xff pattern:$0x75316420] }
  0x60   : > { %738 = vrot.lane.b32.xlu0 %v733_v17, %s1525_s26  ;;  %736 = vrot.lane.b32.xlu2 %v732_v18, %s1525_s26  ;;  %1239 = vst [vmem:[#allocation1] ss:$2 sm:$0xff] %v251_v0  ;;  %v452_v0 = vperm.slane %v1695_v55, 0  ;;  %v560_v17 = vperm.slane %v1733_v16, 0  ;;  %v561_v18 = vperm.slane %v1733_v16, 1 }
  0x61   : > { %v1379_v16 = vld [vmem:[%s2021_s4 + $0x6] sm:$0x3] }
  0x8a   : > { %v381_v19 = vpop.permute.xlu2 %380 }
  0x92   : > { %v259_v21 = vpop.permute.xlu1 %258 }
  0x93   : > { %v383_v27 = vpop.permute.xlu2 %382 }
  0x94   : > { %v385_v36 = vsel %vm384_vm1, %v381_v19, %v383_v27  ;;  %v386_v37 = vsel %vm384_vm1, %v383_v27, %v381_v19 }
  0x95   : > { %v394_v41 = vmul.f32 %v390_v32, %v386_v37  ;;  %v395_v42 = vmul.f32 %v391_v33, %v385_v36 }
  0x97   : > { %v398_v51 = vpack.c.bf16 %v394_v41, %v394_v41  ;;  %v399_v52 = vpack.c.bf16 %v395_v42, %v395_v42  ;;  %v1356_v42 = vld [vmem:[%s2019_s2 + $0xa] sm:$0x3] }
  0x99   : > { %v404_v60 = vsel %vm307_vm2, %v398_v51, 0  ;;  %v407_v61 = vsel %vm307_vm2, %v399_v52, 0 }
  0x9a   : > { %v284_v28 = vpop.permute.xlu0 %283  ;;  %v261_v29 = vpop.permute.xlu1 %260 }
  0x9b   : > { %v265_v30 = vsel %vm264_vm0, %v259_v21, %v261_v29  ;;  %v266_v31 = vsel %vm264_vm0, %v261_v29, %v259_v21 }
  0x9c   : > { %v274_v34 = vmul.f32 %v270_v24, %v265_v30  ;;  %v273_v35 = vmul.f32 %v269_v25, %v266_v31  ;;  %v1754_v31 = vld [vmem:[%s2018_s1 + $0xc] sm:$0x3] }
  0x9e   : > { %v277_v39 = vpack.c.bf16 %v274_v34, %v274_v34  ;;  %v276_v40 = vpack.c.bf16 %v273_v35, %v273_v35 }
  0xa0   : > { %v347_v43 = vsel %vm307_vm2, %v277_v39, 0  ;;  %v344_v44 = vsel %vm307_vm2, %v276_v40, 0  ;;  %v622_v39 = vperm.slane %v1754_v31, 0  ;;  %v623_v40 = vperm.slane %v1754_v31, 1 }
  0xa1   : > { %369 = vmatpush.bf16.msra.mxu3 %v347_v43  ;;  %356 = vmatpush.bf16.msra.mxu2 %v344_v44 }
  0xa2   : > { %v286_v48 = vpop.permute.xlu0 %285  ;;  %v551_v19 = vpop.permute.xlu2 %550 }
  0xa3   : > { %v288_v49 = vsel %vm287_vm3, %v284_v28, %v286_v48  ;;  %v289_v50 = vsel %vm287_vm3, %v286_v48, %v284_v28 }
  0xa4   : > { %1343 = vmatmul.msk.bf16.vlgmr.msra.gmra.mxu3 %vm303_vm4, %v275_v47  ;;  %1342 = vmatmul.msk.bf16.vlgmr.msra.gmra.mxu2 %vm303_vm4, %v275_v47  ;;  %v297_v53 = vmul.f32 %v293_v45, %v289_v50  ;;  %v298_v54 = vmul.f32 %v294_v46, %v288_v49  ;;  %v1777_v50 = vld [vmem:[%s2018_s1 + $0xe] sm:$0x3] }
  0xa6   : > { %v301_v56 = vpack.c.bf16 %v297_v53, %v297_v53  ;;  %v302_v57 = vpack.c.bf16 %v298_v54, %v298_v54  ;;  %v684_v53 = vperm.slane %v1777_v50, 0  ;;  %v685_v54 = vperm.slane %v1777_v50, 1 }
  0xa8   : > { %v309_v62 = vsel %vm307_vm2, %v301_v56, 0  ;;  %v312_v63 = vsel %vm307_vm2, %v302_v57, 0 }
  0xa9   : > { %321 = vmatpush.bf16.msra.mxu0 %v309_v62  ;;  %334 = vmatpush.bf16.msra.mxu1 %v312_v63 }
  0xaa   : > { %v445_v3 = vpop.permute.xlu1 %444  ;;  %v443_v4 = vpop.permute.xlu0 %442 }
  0xab   : > { %v447_v7 = vsel %vm446_vm5, %v443_v4, %v445_v3  ;;  %v448_v8 = vsel %vm446_vm5, %v445_v3, %v443_v4  ;;  %v615_v41 = vpop.permute.xlu2 %614  ;;  %v793_v3 = vld [vmem:[%s2020_s3] sm:$0xf]  ;;  %v1803_v4 = vld [vmem:[%s2018_s1 + $0x10] sm:$0x3] }
  0xac   : > { %1340 = vmatmul.msk.bf16.vlgmr.msra.gmra.mxu0 %vm303_vm4, %v1339_v2  ;;  %1341 = vmatmul.msk.bf16.vlgmr.msra.gmra.mxu1 %vm303_vm4, %v1339_v2  ;;  %v456_v9 = vmul.f32 %v452_v0, %v448_v8  ;;  %v457_v10 = vmul.f32 %v453_v1, %v447_v7 }
  0xad   : > { %416 = vmatpush.bf16.msrb.mxu0 %v404_v60  ;;  %429 = vmatpush.bf16.msrb.mxu1 %v407_v61 }
  0xae   : > { %v460_v11 = vpack.c.bf16 %v456_v9, %v456_v9  ;;  %v461_v12 = vpack.c.bf16 %v457_v10, %v457_v10  ;;  %v746_v10 = vperm.slane %v1803_v4, 0 }
  0xb0   : > { %v466_v13 = vsel %vm307_vm2, %v460_v11, 0  ;;  %v469_v14 = vsel %vm307_vm2, %v461_v12, 0  ;;  %v747_v11 = vperm.slane %v1803_v4, 1  ;;  %v1231_v4 = vld [vmem:[%s2022_s5] sm:$0xf] }
  0xb1   : > { %524 = vmatpush.bf16.msra.mxu0 %v512_v5  ;;  %537 = vmatpush.bf16.msra.mxu1 %v515_v6  ;;  %v1526_v5 = vmov 0  }
  0xb2   : > { %478 = vmatpush.bf16.msrb.mxu2 %v466_v13  ;;  %491 = vmatpush.bf16.msrb.mxu3 %v469_v14  ;;  %v1364_v13 = vld [vmem:[%s2019_s2 + $0xe] sm:$0x3] }
  0xb3   : > { %1452 = vset.pattern.permute.xlu1 %v1526_v5  ;;  %1453 = vset.pattern.permute.xlu0 %v1526_v5 }
  0xb4   : > { %796 = vperm.xlu1 %1452, %v793_v3  }
  0xb5   : > { %1350 = vmatmul.msk.bf16.vlgmr.msrb.gmra.mxu2 %vm303_vm4, %v1349_v15  ;;  %1351 = vmatmul.msk.bf16.vlgmr.msrb.gmra.mxu3 %vm303_vm4, %v1349_v15 }
  0xba   : > { %v553_v21 = vpop.permute.xlu0 %552  ;;  %v737_v12 = vpop.permute.xlu2 %736 }
  0xbb   : > { %v555_v27 = vsel %vm554_vm6, %v551_v19, %v553_v21  ;;  %v556_v28 = vsel %vm554_vm6, %v553_v21, %v551_v19 }
  0xbc   : > { %1346 = vmatmul.msk.bf16.vlgmr.msrb.gmra.mxu0 %vm303_vm4, %v1345_v20  ;;  %1347 = vmatmul.msk.bf16.vlgmr.msrb.gmra.mxu1 %vm303_vm4, %v1345_v20  ;;  %v564_v29 = vmul.f32 %v560_v17, %v555_v27  ;;  %v565_v30 = vmul.f32 %v561_v18, %v556_v28 }
  0xbe   : > { %v568_v34 = vpack.c.bf16 %v564_v29, %v564_v29  ;;  %v569_v35 = vpack.c.bf16 %v565_v30, %v565_v30 }
  0xc0   : > { %v574_v36 = vsel %vm307_vm2, %v568_v34, 0  ;;  %v577_v37 = vsel %vm307_vm2, %v569_v35, 0  ;;  %v1360_v34 = vld [vmem:[%s2019_s2 + $0xc] sm:$0x3]  ;;  %v1368_v35 = vld [vmem:[%s2019_s2 + $0x10] sm:$0x3] }
  0xc1   : > { %586 = vmatpush.bf16.msra.mxu2 %v574_v36  ;;  %599 = vmatpush.bf16.msra.mxu3 %v577_v37 }
  0xc2   : > { %v613_v43 = vpop.permute.xlu1 %612 }
  0xc3   : > { %v617_v44 = vsel %vm616_vm7, %v613_v43, %v615_v41  ;;  %v618_v47 = vsel %vm616_vm7, %v615_v41, %v613_v43 }
  0xc4   : > { %v626_v48 = vmul.f32 %v622_v39, %v617_v44  ;;  %v627_v49 = vmul.f32 %v623_v40, %v618_v47 }
  0xc5   : > { %1357 = vmatmul.msk.bf16.vlgmr.msra.gmra.mxu2 %vm303_vm4, %v1356_v42  ;;  %1358 = vmatmul.msk.bf16.vlgmr.msra.gmra.mxu3 %vm303_vm4, %v1356_v42 }
  0xc6   : > { %v630_v51 = vpack.c.bf16 %v626_v48, %v626_v48  ;;  %v631_v52 = vpack.c.bf16 %v627_v49, %v627_v49 }
  0xc8   : > { %v636_v56 = vsel %vm307_vm2, %v630_v51, 0  ;;  %v639_v57 = vsel %vm307_vm2, %v631_v52, 0 }
  0xc9   : > { %648 = vmatpush.bf16.msrb.mxu0 %v636_v56  ;;  %661 = vmatpush.bf16.msrb.mxu1 %v639_v57 }
  0xca   : > { %v677_v59 = vpop.permute.xlu1 %676  ;;  %v675_v60 = vpop.permute.xlu0 %674 }
  0xcb   : > { %v679_v61 = vsel %vm678_vm8, %v675_v60, %v677_v59  ;;  %v680_v62 = vsel %vm678_vm8, %v677_v59, %v675_v60 }
  0xcc   : > { %1353 = vmatmul.msk.bf16.vlgmr.msra.gmra.mxu0 %vm303_vm4, %v1352_v58  ;;  %1354 = vmatmul.msk.bf16.vlgmr.msra.gmra.mxu1 %vm303_vm4, %v1352_v58  ;;  %v688_v63 = vmul.f32 %v684_v53, %v679_v61  ;;  %v689_v2 = vmul.f32 %v685_v54, %v680_v62 }
  0xce   : > { %v692_v6 = vpack.c.bf16 %v688_v63, %v688_v63  ;;  %v693_v7 = vpack.c.bf16 %v689_v2, %v689_v2 }
  0xd0   : > { %v698_v8 = vsel %vm307_vm2, %v692_v6, 0  ;;  %v701_v9 = vsel %vm307_vm2, %v693_v7, 0 }
  0xd1   : > { %710 = vmatpush.bf16.msrb.mxu2 %v698_v8  ;;  %723 = vmatpush.bf16.msrb.mxu3 %v701_v9 }
  0xd2   : > { %v739_v14 = vpop.permute.xlu0 %738 }
  0xd3   : > { %v741_v15 = vsel %vm740_vm9, %v737_v12, %v739_v14  ;;  %v742_v19 = vsel %vm740_vm9, %v739_v14, %v737_v12 }
  0xd4   : > { %v750_v20 = vmul.f32 %v746_v10, %v741_v15  ;;  %v751_v21 = vmul.f32 %v747_v11, %v742_v19 }
  0xd5   : > { %1365 = vmatmul.msk.bf16.vlgmr.msrb.gmra.mxu2 %vm303_vm4, %v1364_v13  ;;  %1366 = vmatmul.msk.bf16.vlgmr.msrb.gmra.mxu3 %vm303_vm4, %v1364_v13 }
  0xd6   : > { %v754_v27 = vpack.c.bf16 %v750_v20, %v750_v20  ;;  %v755_v28 = vpack.c.bf16 %v751_v21, %v751_v21 }
  0xd8   : > { %v760_v29 = vsel %vm307_vm2, %v754_v27, 0  ;;  %v763_v30 = vsel %vm307_vm2, %v755_v28, 0 }
  0xd9   : > { %772 = vmatpush.bf16.msra.mxu0 %v760_v29  ;;  %785 = vmatpush.bf16.msra.mxu1 %v763_v30 }
  0xdc   : > { %1361 = vmatmul.msk.bf16.vlgmr.msrb.gmra.mxu0 %vm303_vm4, %v1360_v34  ;;  %1362 = vmatmul.msk.bf16.vlgmr.msrb.gmra.mxu1 %vm303_vm4, %v1360_v34 }
  0xec   : > { %1369 = vmatmul.msk.bf16.vlgmr.msra.gmra.mxu0 %vm303_vm4, %v1368_v35  ;;  %1370 = vmatmul.msk.bf16.vlgmr.msra.gmra.mxu1 %vm303_vm4, %v1368_v35 }
 0x127   : > { %v371_v36 = vpop.f32.mrf.mxu3  ;;  %v358_v37 = vpop.f32.mrf.mxu2 }
 0x129   : > { %v323_v41 = vpop.f32.mrf.mxu0  ;;  %v336_v42 = vpop.f32.mrf.mxu1 }
 0x12a   : > { %v372_v8 = vadd.f32 %v371_v36, %v336_v42  ;;  %v359_v9 = vadd.f32 %v358_v37, %v323_v41  ;;  %v797_v41 = vpop.permute.xlu1 %796 }
 0x12f   : > { %v360_v43 = vpop.f32.mrf.mxu2  ;;  %v373_v44 = vpop.f32.mrf.mxu3 }
 0x131   : > { %v325_v47 = vpop.f32.mrf.mxu0  ;;  %v338_v48 = vpop.f32.mrf.mxu1 }
 0x138   : > { %v480_v49 = vpop.f32.mrf.mxu2  ;;  %v493_v51 = vpop.f32.mrf.mxu3 }
 0x139   : > { %v418_v52 = vpop.f32.mrf.mxu0  ;;  %v431_v56 = vpop.f32.mrf.mxu1 }
 0x13a   : > { %v435_v14 = vadd.f32 %v418_v52, %v359_v9  ;;  %v436_v15 = vadd.f32 %v431_v56, %v372_v8 }
 0x13c   : > { %v497_v21 = vadd.f32 %v480_v49, %v435_v14  ;;  %v498_v27 = vadd.f32 %v493_v51, %v436_v15 }
 0x140   : > { %v482_v57 = vpop.f32.mrf.mxu2  ;;  %v495_v58 = vpop.f32.mrf.mxu3 }
 0x141   : > { %v420_v59 = vpop.f32.mrf.mxu0  ;;  %v433_v60 = vpop.f32.mrf.mxu1 }
 0x148   : > { %v588_v61 = vpop.f32.mrf.mxu2  ;;  %v601_v62 = vpop.f32.mrf.mxu3 }
 0x149   : > { %v526_v63 = vpop.f32.mrf.mxu0  ;;  %v539_v2 = vpop.f32.mrf.mxu1 }
 0x14a   : > { %v543_v28 = vadd.f32 %v526_v63, %v497_v21  ;;  %v544_v29 = vadd.f32 %v539_v2, %v498_v27 }
 0x14c   : > { %v605_v44 = vadd.f32 %v588_v61, %v543_v28  ;;  %v606_v47 = vadd.f32 %v601_v62, %v544_v29 }
 0x150   : > { %v590_v3 = vpop.f32.mrf.mxu2  ;;  %v603_v5 = vpop.f32.mrf.mxu3 }
 0x151   : > { %v528_v6 = vpop.f32.mrf.mxu0  ;;  %v541_v7 = vpop.f32.mrf.mxu1 }
 0x158   : > { %v712_v12 = vpop.f32.mrf.mxu2  ;;  %v725_v13 = vpop.f32.mrf.mxu3 }
 0x159   : > { %v650_v19 = vpop.f32.mrf.mxu0  ;;  %v663_v20 = vpop.f32.mrf.mxu1 }
 0x15a   : > { %v667_v48 = vadd.f32 %v650_v19, %v605_v44  ;;  %v668_v57 = vadd.f32 %v663_v20, %v606_v47 }
 0x15c   : > { %v729_v36 = vadd.f32 %v712_v12, %v667_v48  ;;  %v730_v37 = vadd.f32 %v725_v13, %v668_v57 }
 0x160   : > { %v727_v30 = vpop.f32.mrf.mxu3  ;;  %v714_v34 = vpop.f32.mrf.mxu2 }
 0x161   : > { %v652_v35 = vpop.f32.mrf.mxu0  ;;  %v665_v43 = vpop.f32.mrf.mxu1 }
 0x169   : > { %v774_v42 = vpop.f32.mrf.mxu0  ;;  %v787_v52 = vpop.f32.mrf.mxu1 }
 0x16a   : > { %v791_v56 = vadd.f32 %v774_v42, %v729_v36  ;;  %v792_v58 = vadd.f32 %v787_v52, %v730_v37 }
 0x16c   : > { %v799_v59 = vadd.f32 %v797_v41, %v791_v56  ;;  %v800_v49 = vadd.f32 %v797_v41, %v792_v58 }
 0x16e   : > { %v801_v51 = vmax.f32 %v799_v59, 0.0  ;;  %v802_v60 = vmax.f32 %v800_v49, 0.0 }
 0x170   : > { %816 = vrot.lane.b32.xlu0 %v802_v60, %s1519_s15  ;;  %896 = vrot.lane.b32.xlu1 %v801_v51, %s1520_s16  ;;  %v996_v29 = vpack.c.bf16 %v801_v51, %v801_v51  ;;  %v997_v30 = vpack.c.bf16 %v802_v60, %v802_v60 }
 0x171   : > { %814 = vrot.lane.b32.xlu2 %v801_v51, %s1519_s15  ;;  %v789_v61 = vpop.f32.mrf.mxu1  ;;  %v776_v62 = vpop.f32.mrf.mxu0 }
 0x172   : > { %v1002_v48 = vsel %vm307_vm2, %v996_v29, 0  ;;  %v1005_v57 = vsel %vm307_vm2, %v997_v30, 0 }
 0x178   : > { %803 = vrot.lane.b32.xlu0 %v801_v51, %s1518_s14  ;;  %805 = vrot.lane.b32.xlu1 %v802_v60, %s1518_s14 }
 0x179   : > { %898 = vrot.lane.b32.xlu2 %v802_v60, %s1520_s16 }
 0x180   : > { %947 = vrot.lane.b32.xlu0 %v802_v60, %s1521_s17  ;;  %1084 = vrot.lane.b32.xlu1 %v801_v51, %s1523_s19 }
 0x181   : > { %945 = vrot.lane.b32.xlu2 %v801_v51, %s1521_s17  ;;  %s1474_s17 = scalar_lea.hbm %s2023_s6, 16 }
 0x188   : > { %1035 = vrot.lane.b32.xlu0 %v801_v51, %s1522_s18  ;;  %1037 = vrot.lane.b32.xlu1 %v802_v60, %s1522_s18 }
 0x189   : > { %1086 = vrot.lane.b32.xlu2 %v802_v60, %s1523_s19  ;;  %s242_s19 = sand.u32 1, %s1508_s22  }
 0x190   : > { %1184 = vrot.lane.b32.xlu0 %v802_v60, %s1525_s26  ;;  %1133 = vrot.lane.b32.xlu1 %v801_v51, %s1524_s20 }
 0x191   : > { %1182 = vrot.lane.b32.xlu2 %v801_v51, %s1525_s26  ;;  %s1403_s26 = sshll.u32 %s1583_s25, 3  ;;  %s1256_s25 = scalar_lea.sflag [#allocation3], %s242_s19 }
 0x192   : > { %s1267_s10 = scalar_lea.hbm %s2023_s6, %s1403_s26 }
 0x193   : > { %s1271_s13 = sshll.u32 %s1267_s10, 4  ;;  %s1272_s13 = int_to_ptr.hbm [resolvable:$true] %s1271_s13 }
 0x194   : > { %s1468_s28 = sshra.s32 %s1272_s13, 4  ;;  %s1469_s28 = int_to_ptr.hbm [resolvable:$true] %s1468_s28 }
 0x195   : > { %s1470_s14 = scalar_lea.hbm %s1469_s28, 8  ;;  %p1475_p0 = scmp.lt.s32.totalorder %s1469_s28, %s2023_s6 }
 0x196   : > { %p1471_p11 = scmp.ne.s32.totalorder %s1469_s28, %s1470_s14  ;;  %p1476_p1 = scmp.lt.s32.totalorder %s1474_s17, %s1470_s14 }
 0x198   : > { %1234 = vperm.xlu0 %1453, %v1231_v4   ;;  %p1472_p12 = pnand %p1471_p11, %p1600_p5  ;;  %p1477_p2 = por %p1476_p1, %p1475_p0 }
 0x199   : > { %1135 = vrot.lane.b32.xlu2 %v802_v60, %s1524_s20  ;;  %s1335_s20 = sshll.u32 %s242_s19, 3 }
 0x19a   : > { %s244_s11 = scalar_lea.vmem [#allocation2], %s1335_s20  ;;  %p1473_p13 = pneg %p1472_p12 }
 0x19b   : > { %s1269_s12 = sshll.u32 %s244_s11, 4  ;;  %s1270_s12 = int_to_ptr.vmem [resolvable:$true] %s1269_s12 }
 0x19c   : > { %p1478_p3 = pnand %p1477_p2, %p1473_p13 }
 0x1cb   : > { %v815_v63 = vpop.permute.xlu2 %814 }
 0x1d3   : > { %v899_v2 = vpop.permute.xlu2 %898 }
 0x1db   : > { %v946_v6 = vpop.permute.xlu2 %945 }
 0x1e2   : > { %v817_v3 = vpop.permute.xlu0 %816  ;;  %v897_v5 = vpop.permute.xlu1 %896 }
 0x1e3   : > { %v818_v7 = vsel %vm287_vm3, %v815_v63, %v817_v3  ;;  %v819_v8 = vsel %vm287_vm3, %v817_v3, %v815_v63  ;;  %v900_v9 = vsel %vm384_vm1, %v897_v5, %v899_v2  ;;  %v901_v12 = vsel %vm384_vm1, %v899_v2, %v897_v5  ;;  %v1087_v36 = vpop.permute.xlu2 %1086 }
 0x1e4   : > { %v820_v13 = vmul.f32 %v819_v8, %v293_v45  ;;  %v821_v14 = vmul.f32 %v818_v7, %v294_v46  ;;  %v902_v15 = vmul.f32 %v901_v12, %v390_v32  ;;  %v903_v19 = vmul.f32 %v900_v9, %v391_v33 }
 0x1e6   : > { %v824_v20 = vpack.c.bf16 %v820_v13, %v820_v13  ;;  %v825_v21 = vpack.c.bf16 %v821_v14, %v821_v14  ;;  %v906_v27 = vpack.c.bf16 %v902_v15, %v902_v15  ;;  %v907_v28 = vpack.c.bf16 %v903_v19, %v903_v19 }
 0x1e8   : > { %v830_v34 = vsel %vm307_vm2, %v824_v20, 0  ;;  %v833_v35 = vsel %vm307_vm2, %v825_v21, 0  ;;  %v912_v45 = vsel %vm307_vm2, %v906_v27, 0  ;;  %v915_v38 = vsel %vm307_vm2, %v907_v28, 0 }
 0x1e9   : > { %842 = vmatpush.bf16.msra.mxu2 %v830_v34  ;;  %855 = vmatpush.bf16.msra.mxu3 %v833_v35 }
 0x1ea   : > { %v804_v32 = vpop.permute.xlu0 %803  ;;  %v806_v33 = vpop.permute.xlu1 %805 }
 0x1eb   : > { %v807_v46 = vsel %vm264_vm0, %v804_v32, %v806_v33  ;;  %v808_v43 = vsel %vm264_vm0, %v806_v33, %v804_v32  ;;  %v1183_v3 = vpop.permute.xlu2 %1182 }
 0x1ec   : > { %v809_v44 = vmul.f32 %v808_v43, %v269_v25  ;;  %v810_v47 = vmul.f32 %v807_v46, %v270_v24  ;;  %1372 = vmatmul.msk.bf16.vlgmr.msra.gmra.mxu2 %vm303_vm4, %v1371_v26  ;;  %1373 = vmatmul.msk.bf16.vlgmr.msra.gmra.mxu3 %vm303_vm4, %v1371_v26  ;;  %v1388_v43 = vld [vmem:[%s2021_s4 + $0xc] sm:$0x3] }
 0x1ed   : > { %924 = vmatpush.bf16.msrb.mxu2 %v912_v45  ;;  %937 = vmatpush.bf16.msrb.mxu3 %v915_v38 }
 0x1ee   : > { %v812_v37 = vpack.c.bf16 %v809_v44, %v809_v44  ;;  %v813_v41 = vpack.c.bf16 %v810_v47, %v810_v47  ;;  %v1391_v44 = vld [vmem:[%s2021_s4 + $0xe] sm:$0x3]  ;;  %v1394_v47 = vld [vmem:[%s2021_s4 + $0x10] sm:$0x3] }
 0x1f0   : > { %v865_v42 = vsel %vm307_vm2, %v812_v37, 0  ;;  %v868_v25 = vsel %vm307_vm2, %v813_v41, 0 }
 0x1f1   : > { %1014 = vmatpush.bf16.msra.mxu2 %v1002_v48  ;;  %1027 = vmatpush.bf16.msra.mxu3 %v1005_v57 }
 0x1f2   : > { %877 = vmatpush.bf16.msrb.mxu0 %v865_v42  ;;  %890 = vmatpush.bf16.msrb.mxu1 %v868_v25  ;;  %v948_v24 = vpop.permute.xlu0 %947  ;;  %v1085_v52 = vpop.permute.xlu1 %1084 }
 0x1f3   : > { %v949_v56 = vsel %vm446_vm5, %v946_v6, %v948_v24  ;;  %v950_v58 = vsel %vm446_vm5, %v948_v24, %v946_v6  ;;  %v1088_v59 = vsel %vm616_vm7, %v1085_v52, %v1087_v36  ;;  %v1089_v49 = vsel %vm616_vm7, %v1087_v36, %v1085_v52 }
 0x1f4   : > { %v951_v51 = vmul.f32 %v950_v58, %v452_v0  ;;  %v952_v60 = vmul.f32 %v949_v56, %v453_v1  ;;  %v1090_v61 = vmul.f32 %v1088_v59, %v622_v39  ;;  %v1091_v62 = vmul.f32 %v1089_v49, %v623_v40  ;;  %v1376_v1 = vld [vmem:[%s2021_s4 + $0x4] sm:$0x3] }
 0x1f5   : > { %1374 = vmatmul.msk.bf16.vlgmr.msrb.gmra.mxu0 %vm303_vm4, %v811_v23  ;;  %1375 = vmatmul.msk.bf16.vlgmr.msrb.gmra.mxu1 %vm303_vm4, %v811_v23 }
 0x1f6   : > { %v955_v63 = vpack.c.bf16 %v951_v51, %v951_v51  ;;  %v956_v2 = vpack.c.bf16 %v952_v60, %v952_v60  ;;  %v1094_v5 = vpack.c.bf16 %v1090_v61, %v1090_v61  ;;  %v1095_v6 = vpack.c.bf16 %v1091_v62, %v1091_v62 }
 0x1f8   : > { %v961_v0 = vsel %vm307_vm2, %v955_v63, 0  ;;  %v964_v55 = vsel %vm307_vm2, %v956_v2, 0  ;;  %v1100_v12 = vsel %vm307_vm2, %v1094_v5, 0  ;;  %v1103_v13 = vsel %vm307_vm2, %v1095_v6, 0 }
 0x1f9   : > { %973 = vmatpush.bf16.msra.mxu0 %v961_v0  ;;  %986 = vmatpush.bf16.msra.mxu1 %v964_v55 }
 0x1fa   : > { %v1036_v31 = vpop.permute.xlu0 %1035  ;;  %v1038_v39 = vpop.permute.xlu1 %1037 }
 0x1fb   : > { %v1039_v40 = vsel %vm554_vm6, %v1036_v31, %v1038_v39  ;;  %v1040_v7 = vsel %vm554_vm6, %v1038_v39, %v1036_v31 }
 0x1fc   : > { %v1041_v8 = vmul.f32 %v1039_v40, %v560_v17  ;;  %v1042_v9 = vmul.f32 %v1040_v7, %v561_v18  ;;  %1377 = vmatmul.msk.bf16.vlgmr.msrb.gmra.mxu2 %vm303_vm4, %v1376_v1  ;;  %1378 = vmatmul.msk.bf16.vlgmr.msrb.gmra.mxu3 %vm303_vm4, %v1376_v1  ;;  %v1136_v17 = vpop.permute.xlu2 %1135 }
 0x1fd   : > { %1112 = vmatpush.bf16.msrb.mxu2 %v1100_v12  ;;  %1125 = vmatpush.bf16.msrb.mxu3 %v1103_v13 }
 0x1fe   : > { %v1045_v14 = vpack.c.bf16 %v1041_v8, %v1041_v8  ;;  %v1046_v15 = vpack.c.bf16 %v1042_v9, %v1042_v9 }
 0x200   : > { %v1051_v19 = vsel %vm307_vm2, %v1045_v14, 0  ;;  %v1054_v20 = vsel %vm307_vm2, %v1046_v15, 0 }
 0x201   : > { %1063 = vmatpush.bf16.msrb.mxu0 %v1051_v19  ;;  %1076 = vmatpush.bf16.msrb.mxu1 %v1054_v20 }
 0x202   : > { %v1185_v18 = vpop.permute.xlu0 %1184  ;;  %v1134_v21 = vpop.permute.xlu1 %1133 }
 0x203   : > { %v1186_v27 = vsel %vm740_vm9, %v1183_v3, %v1185_v18  ;;  %v1187_v28 = vsel %vm740_vm9, %v1185_v18, %v1183_v3  ;;  %v1137_v29 = vsel %vm678_vm8, %v1134_v21, %v1136_v17  ;;  %v1138_v30 = vsel %vm678_vm8, %v1136_v17, %v1134_v21 }
 0x204   : > { %v1188_v34 = vmul.f32 %v1186_v27, %v746_v10  ;;  %v1189_v35 = vmul.f32 %v1187_v28, %v747_v11  ;;  %v1139_v45 = vmul.f32 %v1137_v29, %v684_v53  ;;  %v1140_v38 = vmul.f32 %v1138_v30, %v685_v54  ;;  %v1382_v53 = vld [vmem:[%s2021_s4 + $0x8] sm:$0x3]  ;;  %v1385_v11 = vld [vmem:[%s2021_s4 + $0xa] sm:$0x3] }
 0x205   : > { %1380 = vmatmul.msk.bf16.vlgmr.msra.gmra.mxu0 %vm303_vm4, %v1379_v16  ;;  %1381 = vmatmul.msk.bf16.vlgmr.msra.gmra.mxu1 %vm303_vm4, %v1379_v16 }
 0x206   : > { %v1143_v26 = vpack.c.bf16 %v1139_v45, %v1139_v45  ;;  %v1144_v32 = vpack.c.bf16 %v1140_v38, %v1140_v38  ;;  %v1192_v22 = vpack.c.bf16 %v1188_v34, %v1188_v34  ;;  %v1193_v33 = vpack.c.bf16 %v1189_v35, %v1189_v35 }
 0x208   : > { %v1149_v46 = vsel %vm307_vm2, %v1143_v26, 0  ;;  %v1152_v10 = vsel %vm307_vm2, %v1144_v32, 0  ;;  %v1198_v50 = vsel %vm307_vm2, %v1192_v22, 0  ;;  %v1201_v54 = vsel %vm307_vm2, %v1193_v33, 0 }
 0x209   : > { %1161 = vmatpush.bf16.msra.mxu0 %v1149_v46  ;;  %1174 = vmatpush.bf16.msra.mxu1 %v1152_v10  ;;  %v1240_v32 = vld.sshfl [vmem:[#allocation1] sm:$0xff pattern:$0x75316420]  ;;  %v1241_v22 = vld.sshfl [vmem:[#allocation1 + $0x8] sm:$0xff pattern:$0x75316420] }
 0x20a   : > { %v1235_v34 = vpop.permute.xlu0 %1234 }
 0x20c   : > { %1383 = vmatmul.msk.bf16.vlgmr.msra.gmra.mxu2 %vm303_vm4, %v1382_v53  ;;  %1384 = vmatmul.msk.bf16.vlgmr.msra.gmra.mxu3 %vm303_vm4, %v1382_v53 }
 0x20d   : > { %1210 = vmatpush.bf16.msra.mxu2 %v1198_v50  ;;  %1223 = vmatpush.bf16.msra.mxu3 %v1201_v54 }
 0x215   : > { %1386 = vmatmul.msk.bf16.vlgmr.msrb.gmra.mxu0 %vm303_vm4, %v1385_v11  ;;  %1387 = vmatmul.msk.bf16.vlgmr.msrb.gmra.mxu1 %vm303_vm4, %v1385_v11 }
 0x21c   : > { %1389 = vmatmul.msk.bf16.vlgmr.msrb.gmra.mxu2 %vm303_vm4, %v1388_v43  ;;  %1390 = vmatmul.msk.bf16.vlgmr.msrb.gmra.mxu3 %vm303_vm4, %v1388_v43 }
 0x225   : > { %1392 = vmatmul.msk.bf16.vlgmr.msra.gmra.mxu0 %vm303_vm4, %v1391_v44  ;;  %1393 = vmatmul.msk.bf16.vlgmr.msra.gmra.mxu1 %vm303_vm4, %v1391_v44 }
 0x22c   : > { %1395 = vmatmul.msk.bf16.vlgmr.msra.gmra.mxu2 %vm303_vm4, %v1394_v47  ;;  %1396 = vmatmul.msk.bf16.vlgmr.msra.gmra.mxu3 %vm303_vm4, %v1394_v47 }
 0x26f   : > { %v844_v48 = vpop.f32.mrf.mxu2  ;;  %v857_v57 = vpop.f32.mrf.mxu3 }
 0x272   : > { %v879_v36 = vpop.f32.mrf.mxu0  ;;  %v892_v37 = vpop.f32.mrf.mxu1 }
 0x273   : > { %v880_v55 = vadd.f32 %v879_v36, %v844_v48  ;;  %v893_v1 = vadd.f32 %v892_v37, %v857_v57 }
 0x277   : > { %v846_v41 = vpop.f32.mrf.mxu2  ;;  %v859_v42 = vpop.f32.mrf.mxu3 }
 0x27a   : > { %v881_v25 = vpop.f32.mrf.mxu0  ;;  %v894_v23 = vpop.f32.mrf.mxu1 }
 0x27f   : > { %v926_v24 = vpop.f32.mrf.mxu2  ;;  %v939_v52 = vpop.f32.mrf.mxu3 }
 0x280   : > { %v943_v31 = vadd.f32 %v926_v24, %v880_v55  ;;  %v944_v39 = vadd.f32 %v939_v52, %v893_v1 }
 0x282   : > { %v975_v56 = vpop.f32.mrf.mxu0  ;;  %v988_v58 = vpop.f32.mrf.mxu1 }
 0x283   : > { %v992_v9 = vadd.f32 %v975_v56, %v943_v31  ;;  %v993_v12 = vadd.f32 %v988_v58, %v944_v39 }
 0x287   : > { %v928_v59 = vpop.f32.mrf.mxu2  ;;  %v941_v49 = vpop.f32.mrf.mxu3 }
 0x28a   : > { %v977_v51 = vpop.f32.mrf.mxu0  ;;  %v990_v60 = vpop.f32.mrf.mxu1 }
 0x28f   : > { %v1016_v61 = vpop.f32.mrf.mxu2  ;;  %v1029_v62 = vpop.f32.mrf.mxu3 }
 0x290   : > { %v1033_v14 = vadd.f32 %v1016_v61, %v992_v9  ;;  %v1034_v15 = vadd.f32 %v1029_v62, %v993_v12 }
 0x292   : > { %v1065_v63 = vpop.f32.mrf.mxu0  ;;  %v1078_v2 = vpop.f32.mrf.mxu1 }
 0x293   : > { %v1082_v17 = vadd.f32 %v1065_v63, %v1033_v14  ;;  %v1083_v16 = vadd.f32 %v1078_v2, %v1034_v15 }
 0x297   : > { %v1018_v3 = vpop.f32.mrf.mxu2  ;;  %v1031_v5 = vpop.f32.mrf.mxu3 }
 0x29a   : > { %v1067_v6 = vpop.f32.mrf.mxu0  ;;  %v1080_v0 = vpop.f32.mrf.mxu1 }
 0x29f   : > { %v1114_v40 = vpop.f32.mrf.mxu2  ;;  %v1127_v7 = vpop.f32.mrf.mxu3 }
 0x2a0   : > { %v1131_v21 = vadd.f32 %v1114_v40, %v1082_v17  ;;  %v1132_v27 = vadd.f32 %v1127_v7, %v1083_v16 }
 0x2a2   : > { %v1163_v8 = vpop.f32.mrf.mxu0  ;;  %v1176_v13 = vpop.f32.mrf.mxu1 }
 0x2a3   : > { %v1180_v29 = vadd.f32 %v1163_v8, %v1131_v21  ;;  %v1181_v30 = vadd.f32 %v1176_v13, %v1132_v27 }
 0x2a7   : > { %v1116_v19 = vpop.f32.mrf.mxu2  ;;  %v1129_v20 = vpop.f32.mrf.mxu3 }
 0x2aa   : > { %v1165_v18 = vpop.f32.mrf.mxu0  ;;  %v1178_v28 = vpop.f32.mrf.mxu1 }
 0x2af   : > { %v1212_v35 = vpop.f32.mrf.mxu2  ;;  %v1225_v45 = vpop.f32.mrf.mxu3 }
 0x2b0   : > { %v1229_v38 = vadd.f32 %v1212_v35, %v1180_v29  ;;  %v1230_v26 = vadd.f32 %v1225_v45, %v1181_v30 }
 0x2b2   : > { %v1237_v33 = vadd.f32 %v1235_v34, %v1229_v38  ;;  %v1238_v46 = vadd.f32 %v1235_v34, %v1230_v26 }
 0x2b4   : > { %v1244_v10 = vadd.f32 %v1240_v32, %v1237_v33  ;;  %v1245_v53 = vadd.f32 %v1241_v22, %v1238_v46 }
 0x2b6   : > { %v1247_v50 = vmax.f32 %v1245_v53, 0.0  ;;  %v1246_v11 = vmax.f32 %v1244_v10, 0.0 }
 0x2b7   : > { %v1227_v54 = vpop.f32.mrf.mxu3  ;;  %v1214_v4 = vpop.f32.mrf.mxu2 }
 0x2b8   : > { %v1250_v43 = vrot.slane %v1247_v50, 4 }
 0x2ba   : > { %v1252_v44 = vsel %vm1251_vm10, %v1246_v11, %v1250_v43 }
 0x2bb   : > { %1254 = vst [vmem:[%s244_s11] sm:$0xff] %v1252_v44 }
 0x2bc   : > { %1481 = shalt.err (!%p1478_p3)
}
 0x2bd   : > { %1404 = dma.vmem_to_hbm [thread:$0]  (%p1600_p5), %s1270_s12, 128, %s1272_s13, %s1256_s25  }
 0x2be PF: > { %p1410_p4 = scmp.ge.s32.totalorder %s1516_s24, 2  ;;  %s1283_s19 = sand.u32 1, %s1504_s21  }
 0x2bf   : > { %s1284_s26 = scalar_lea.sflag [#allocation3], %s1283_s19 }
 0x2c0   : > { %p1407_p7 = pnand %p1410_p4, %p1604_p6 }
 0x2c2   : > { %p1408_p8 = pneg %p1407_p7 }
 0x2c4   : > { %1499 = dma.done.wait (%p1408_p8), %s1284_s26, 128  }
 0x2c5   : > { %1501 = vsyncadd (%p1408_p8), %s1284_s26, 4294967168  ;;  %p16_p9 = scmp.ge.s32.totalorder %s1587_s27, 4   ;;  %s2026_s21 = smov %s1508_s22 }
 0x2c6   : > { %s2027_s22 = smov %s1512_s23  ;;  %s2028_s23 = smov %s1598_s30 }
 0x2c7   : > { %s2029_s24 = smov %s1587_s27  ;;  %18 = sbr.rel (!%p16_p9) target bundleno = 3 (0x3), region = 102 }
 0x2cc   :  { %1290 = vsyncpa [#allocation3], 1 }
 0x2cd   :  { %1292 = vsyncpa [#allocation3 + $0x1], 1 }

</bundles_post_ra>
